<compile_context>
chip_gen: v7x
topology: tpu7x:2x2x1
jax: 0.10.0
libtpu: 0.0.40
codegen_flags: <defaults>
</compile_context>

<pallas_src>
import functools

import jax
import jax.numpy as jnp
from jax import lax
from jax.experimental import pallas as pl
from jax.experimental.pallas import tpu as pltpu


# ----------------------------- JAX glue (resize / reshape) -------------------
def _interp_linear_axis(x, axis, out_size):
    """1D linear resize along `axis` with align_corners=True semantics."""
    in_size = x.shape[axis]
    if out_size == 1 or in_size == 1:
        src = jnp.zeros((out_size,), jnp.float32)
    else:
        src = jnp.arange(out_size, dtype=jnp.float32) * ((in_size - 1) / (out_size - 1))
    lo = jnp.clip(jnp.floor(src).astype(jnp.int32), 0, in_size - 1)
    hi = jnp.clip(lo + 1, 0, in_size - 1)
    w = src - lo.astype(jnp.float32)
    xl = jnp.take(x, lo, axis=axis)
    xh = jnp.take(x, hi, axis=axis)
    wshape = [1] * x.ndim
    wshape[axis] = out_size
    w = w.reshape(wshape)
    return xl * (1.0 - w) + xh * w


def trilinear_resize_align_corners(x, size):
    # TODO(synk): gather-based trilinear resize stays in plain JAX glue
    # (data-dependent indexing; not part of the matmul/attention hot path).
    for axis, s in zip((2, 3, 4), size):
        x = _interp_linear_axis(x, axis, s)
    return x


# ----------------------------- weight fusion (wrapper-side, one-time) --------
def fuse_params(params, pos):
    """Collapse the affine projection chains and pack the kernel parameters.

    Done once in plain JAX (weight-only); the kernel then sees only 6 parameter
    arrays instead of 23.  The attention scale 1/sqrt(C) is absorbed into the
    fused query weight and bias so the kernel never scales the scores.
    """
    with jax.default_matmul_precision('float32'):
        C = params['wqi'].shape[0]
        scale = 1.0 / (float(C) ** 0.5)

        # memory path:  q/k/v = mem @ (W_* @ W_*in) + b_*in   -> one (C, 3C) weight
        wq_f = (params['wqm'] @ params['wqi']) * scale
        wk_f = params['wkm'] @ params['wki']
        wv_f = params['wvm'] @ params['wvi']
        w_mem = jnp.concatenate([wq_f, wk_f, wv_f], axis=1)                # (C, 3C)
        b_mem = jnp.concatenate([params['bqi'] * scale,
                                 params['bki'], params['bvi']], axis=1)    # (1, 3C)

        # unet path: fm = x @ Wproj + pos;  k_u = fm @ Wku @ Wki + bki; v_u likewise
        wku_i = params['wku'] @ params['wki']                              # (C, C)
        wvu_i = params['wvu'] @ params['wvi']                              # (C, C)
        w_unet = jnp.concatenate([params['wproj'] @ wku_i,
                                  params['wproj'] @ wvu_i], axis=1)        # (Cin, 2C)
        b_unet = jnp.concatenate([pos @ wku_i + params['bki'],
                                  pos @ wvu_i + params['bvi']], axis=1)    # (S, 2C)

    # remaining square weights in one slab, all per-channel vectors in one slab
    w_pack = jnp.stack([params['wo'], params['w1'], params['w2']], axis=0)  # (3, C, C)
    vecs = jnp.concatenate([params['bo'], params['b1'], params['g1'], params['be1'],
                            params['b2'], params['g2'], params['be2']], axis=0)  # (7, C)
    return dict(w_mem=w_mem, b_mem=b_mem, w_unet=w_unet, b_unet=b_unet,
                w_pack=w_pack, vecs=vecs)


# ----------------------------- Pallas kernel --------------------------------
def _attention_block_kernel(x_ref, mem_ref, w_mem_ref, b_mem_ref, w_unet_ref,
                            b_unet_ref, w_pack_ref, vecs_ref, out_ref):
    f32 = jnp.float32
    B, S, Cin = x_ref.shape
    _, M, C = mem_ref.shape

    vecs = vecs_ref[...]                       # (7, C): bo b1 g1 be1 b2 g2 be2
    bo, b1, g1, be1 = vecs[0:1], vecs[1:2], vecs[2:3], vecs[3:4]
    b2, g2, be2 = vecs[4:5], vecs[5:6], vecs[6:7]

    # ---- fused projections: two dots replace the original projection chain ----
    # q is already pre-scaled by 1/sqrt(C) (folded into w_mem / b_mem at fuse time).
    mp = jnp.dot(mem_ref[...].reshape(B * M, C), w_mem_ref[...],
                 preferred_element_type=f32) + b_mem_ref[...]              # (B*M, 3C)
    mp = mp.reshape(B, M, 3 * C)
    q = mp[:, :, 0:C]
    k_m = mp[:, :, C:2 * C]
    v_m = mp[:, :, 2 * C:3 * C]

    up = jnp.dot(x_ref[...].reshape(B * S, Cin), w_unet_ref[...],
                 preferred_element_type=f32)                               # (B*S, 2C)
    up = up.reshape(B, S, 2 * C) + b_unet_ref[...][None]                   # + (pos@W + b)
    k_u = up[:, :, 0:C]
    v_u = up[:, :, C:2 * C]

    # ---- single-head scaled-dot-product attention over [memory ; unet] keys ----
    bmm = functools.partial(jnp.einsum, preferred_element_type=f32)
    s_m = bmm('bmg,bng->bmn', q, k_m)                                      # (B, M, M)
    s_u = bmm('bmg,bsg->bms', q, k_u)                                      # (B, M, S)
    mx = jnp.maximum(jnp.max(s_m, axis=-1, keepdims=True),
                     jnp.max(s_u, axis=-1, keepdims=True))
    p_m = jnp.exp(s_m - mx)
    p_u = jnp.exp(s_u - mx)
    denom = (jnp.sum(p_m, axis=-1, keepdims=True)
             + jnp.sum(p_u, axis=-1, keepdims=True))
    ctx = (bmm('bmn,bng->bmg', p_m, v_m)
           + bmm('bms,bsg->bmg', p_u, v_u)) * pl.reciprocal(denom, approx=True)

    attn = jnp.dot(ctx.reshape(B * M, C), w_pack_ref[0],
                   preferred_element_type=f32) + bo                        # (B*M, C)

    # ---- final_mlp: Linear -> BatchNorm1d (training-mode batch stats) -> ReLU, x2 ----
    def bn_relu_2d(h2d, gamma, beta):
        n = h2d.shape[0]
        mean = jnp.sum(h2d, axis=0, keepdims=True) * (1.0 / n)
        d = h2d - mean
        var = jnp.sum(d * d, axis=0, keepdims=True) * (1.0 / n)
        return jnp.maximum(d * lax.rsqrt(var + 1e-5) * gamma + beta, 0.0)

    h = jnp.dot(attn, w_pack_ref[1], preferred_element_type=f32) + b1
    h = bn_relu_2d(h, g1, be1)
    h = jnp.dot(h, w_pack_ref[2], preferred_element_type=f32) + b2
    h = bn_relu_2d(h, g2, be2)
    out_ref[...] = h.reshape(B, M, C)


# ----------------------------- wrapper ---------------------------------------
def attention_block_forward(feature_map, memory, fused, encoding_scale_size):
    B = feature_map.shape[0]
    fm = trilinear_resize_align_corners(feature_map.astype(jnp.float32),
                                        encoding_scale_size)
    Cin = fm.shape[1]
    S = fm.shape[2] * fm.shape[3] * fm.shape[4]
    x_flat = jnp.transpose(fm.reshape(B, Cin, S), (0, 2, 1))               # (B, S, Cin)
    C = fused['w_pack'].shape[-1]
    M = memory.shape[1]

    args = (x_flat, memory.astype(jnp.float32),
            fused['w_mem'], fused['b_mem'], fused['w_unet'], fused['b_unet'],
            fused['w_pack'], fused['vecs'])
    in_specs = [pl.BlockSpec(memory_space=pltpu.MemorySpace.VMEM) for _ in args]
    return pl.pallas_call(
        _attention_block_kernel,
        out_shape=jax.ShapeDtypeStruct((B, M, C), jnp.float32),
        in_specs=in_specs,
        out_specs=pl.BlockSpec(memory_space=pltpu.MemorySpace.VMEM),
    )(*args)


# ----------------------------- plain-JAX reference ---------------------------
def reference_forward(feature_map, memory, pos, params, size):
    with jax.default_matmul_precision('float32'):
        fm = trilinear_resize_align_corners(feature_map.astype(jnp.float32), size)
        B, Cin = fm.shape[:2]
        S = fm.shape[2] * fm.shape[3] * fm.shape[4]
        x = jnp.transpose(fm.reshape(B, Cin, S), (0, 2, 1)) @ params['wproj'] + pos[None]
        qm = memory @ params['wqm']
        km = memory @ params['wkm']
        vm = memory @ params['wvm']
        ku = x @ params['wku']
        vu = x @ params['wvu']
        key = jnp.concatenate([km, ku], axis=1)
        val = jnp.concatenate([vm, vu], axis=1)
        q = qm @ params['wqi'] + params['bqi']
        k = key @ params['wki'] + params['bki']
        v = val @ params['wvi'] + params['bvi']
        C = q.shape[-1]
        s = jnp.einsum('bmg,bng->bmn', q, k) / (C ** 0.5)
        p = jax.nn.softmax(s, axis=-1)
        ctx = jnp.einsum('bmn,bng->bmg', p, v)
        attn = ctx @ params['wo'] + params['bo']

        def bn_relu(h, g, b):
            mean = jnp.mean(h, axis=(0, 1), keepdims=True)
            var = jnp.mean((h - mean) ** 2, axis=(0, 1), keepdims=True)
            return jnp.maximum((h - mean) / jnp.sqrt(var + 1e-5) * g + b, 0.0)

        h1 = bn_relu(attn @ params['w1'] + params['b1'], params['g1'], params['be1'])
        h2 = bn_relu(h1 @ params['w2'] + params['b2'], params['g2'], params['be2'])
        return h2


# ----------------------------- main ------------------------------------------
if __name__ == "__main__":
    B, Cin, C, M = 2, 4, 32, 8
    encoding_scale_size = (4, 4, 8)        # 3D -> 'trilinear', align_corners=True
    S = encoding_scale_size[0] * encoding_scale_size[1] * encoding_scale_size[2]
    in_spatial = (5, 6, 7)

    root = jax.random.PRNGKey(0)
    keys = iter(jax.random.split(root, 32))

    def rand(shape, scale=0.1):
        return jax.random.normal(next(keys), shape, jnp.float32) * scale

    feature_map = rand((B, Cin) + in_spatial, 1.0)
    memory = rand((B, M, C), 1.0)
    shared_position_embedding = rand((S, C), 0.1)

    # nn.Conv3d(in_channels, encoding_channels, 1, bias=False): weight (C, Cin, 1, 1, 1)
    conv_w = rand((C, Cin, 1, 1, 1), 0.3)

    # nn.Linear(in, out): weight (out, in); y = x @ W.T  -> pre-transpose once.
    def lin_w():
        return rand((C, C), 0.2).T

    params = dict(
        wproj=conv_w.reshape(C, Cin).T,
        wqm=lin_w(), wkm=lin_w(), wvm=lin_w(), wku=lin_w(), wvu=lin_w(),
        # MultiheadAttention: split in_proj (Wq, Wk, Wv) + biases, out_proj + bias.
        wqi=lin_w(), wki=lin_w(), wvi=lin_w(),
        bqi=rand((1, C), 0.05), bki=rand((1, C), 0.05), bvi=rand((1, C), 0.05),
        wo=lin_w(), bo=rand((1, C), 0.05),
        # final_mlp: Linear(+bias) / BatchNorm1d(gamma, beta) / ReLU, twice.
        w1=lin_w(), b1=rand((1, C), 0.05),
        g1=1.0 + rand((1, C), 0.05), be1=rand((1, C), 0.05),
        w2=lin_w(), b2=rand((1, C), 0.05),
        g2=1.0 + rand((1, C), 0.05), be2=rand((1, C), 0.05),
    )

    # one-time weight fusion / packing (off the per-call hot path)
    fused = jax.tree_util.tree_map(jax.block_until_ready,
                                   fuse_params(params, shared_position_embedding))

    out = attention_block_forward(feature_map, memory, fused, encoding_scale_size)
    out = jax.block_until_ready(out)

    ref = reference_forward(feature_map, memory, shared_position_embedding,
                            params, encoding_scale_size)
    assert out.shape == (B, M, C), out.shape
    assert bool(jnp.all(jnp.isfinite(out)))
    assert bool(jnp.allclose(out, ref, atol=3e-2, rtol=3e-2)), \
        float(jnp.max(jnp.abs(out - ref)))
    print("KERNEL_OK")
</pallas_src>

<mosaic_0001>
module attributes {stable_mosaic.version = 11 : i64} {
  func.func @_attention_block_kernel(%arg0: memref<2x128x4xf32, #tpu.memory_space<vmem>>, %arg1: memref<2x8x32xf32, #tpu.memory_space<vmem>>, %arg2: memref<32x96xf32, #tpu.memory_space<vmem>>, %arg3: memref<1x96xf32, #tpu.memory_space<vmem>>, %arg4: memref<4x64xf32, #tpu.memory_space<vmem>>, %arg5: memref<128x64xf32, #tpu.memory_space<vmem>>, %arg6: memref<3x32x32xf32, #tpu.memory_space<vmem>>, %arg7: memref<7x32xf32, #tpu.memory_space<vmem>>, %arg8: memref<2x8x32xf32, #tpu.memory_space<vmem>>) attributes {dimension_semantics = [], scalar_prefetch = 0 : i64, scratch_operands = 0 : i64, tpu.core_type = #tpu.core_type<tc>} {
    %c0 = arith.constant 0 : index
    %c0_0 = arith.constant 0 : index
    %0 = vector.load %arg7[%c0, %c0_0] : memref<7x32xf32, #tpu.memory_space<vmem>>, vector<7x32xf32>
    %1 = vector.extract_strided_slice %0 {offsets = [0, 0], sizes = [1, 32], strides = [1, 1]} : vector<7x32xf32> to vector<1x32xf32>
    %2 = vector.extract_strided_slice %0 {offsets = [1, 0], sizes = [1, 32], strides = [1, 1]} : vector<7x32xf32> to vector<1x32xf32>
    %3 = vector.extract_strided_slice %0 {offsets = [2, 0], sizes = [1, 32], strides = [1, 1]} : vector<7x32xf32> to vector<1x32xf32>
    %4 = vector.extract_strided_slice %0 {offsets = [3, 0], sizes = [1, 32], strides = [1, 1]} : vector<7x32xf32> to vector<1x32xf32>
    %5 = vector.extract_strided_slice %0 {offsets = [4, 0], sizes = [1, 32], strides = [1, 1]} : vector<7x32xf32> to vector<1x32xf32>
    %6 = vector.extract_strided_slice %0 {offsets = [5, 0], sizes = [1, 32], strides = [1, 1]} : vector<7x32xf32> to vector<1x32xf32>
    %7 = vector.extract_strided_slice %0 {offsets = [6, 0], sizes = [1, 32], strides = [1, 1]} : vector<7x32xf32> to vector<1x32xf32>
    %c0_1 = arith.constant 0 : index
    %c0_2 = arith.constant 0 : index
    %c0_3 = arith.constant 0 : index
    %8 = vector.load %arg1[%c0_1, %c0_2, %c0_3] : memref<2x8x32xf32, #tpu.memory_space<vmem>>, vector<2x8x32xf32>
    %9 = vector.shape_cast %8 : vector<2x8x32xf32> to vector<16x32xf32>
    %c0_4 = arith.constant 0 : index
    %c0_5 = arith.constant 0 : index
    %10 = vector.load %arg2[%c0_4, %c0_5] : memref<32x96xf32, #tpu.memory_space<vmem>>, vector<32x96xf32>
    %cst = arith.constant dense<0.000000e+00> : vector<16x96xf32>
    %11 = tpu.matmul %9, %10, %cst {dimension_numbers = #tpu.dot_dimension_numbers<[1], [0], [0], [1], [0, 0, 1, 1], [], []>} : vector<16x32xf32>, vector<32x96xf32>, vector<16x96xf32> -> vector<16x96xf32>
    %c0_6 = arith.constant 0 : index
    %c0_7 = arith.constant 0 : index
    %12 = vector.load %arg3[%c0_6, %c0_7] : memref<1x96xf32, #tpu.memory_space<vmem>>, vector<1x96xf32>
    %13 = vector.broadcast %12 : vector<1x96xf32> to vector<16x96xf32>
    %14 = arith.addf %11, %13 : vector<16x96xf32>
    %15 = vector.shape_cast %14 : vector<16x96xf32> to vector<2x8x96xf32>
    %16 = vector.extract_strided_slice %15 {offsets = [0, 0, 0], sizes = [2, 8, 32], strides = [1, 1, 1]} : vector<2x8x96xf32> to vector<2x8x32xf32>
    %17 = vector.extract_strided_slice %15 {offsets = [0, 0, 32], sizes = [2, 8, 32], strides = [1, 1, 1]} : vector<2x8x96xf32> to vector<2x8x32xf32>
    %18 = vector.extract_strided_slice %15 {offsets = [0, 0, 64], sizes = [2, 8, 32], strides = [1, 1, 1]} : vector<2x8x96xf32> to vector<2x8x32xf32>
    %c0_8 = arith.constant 0 : index
    %c0_9 = arith.constant 0 : index
    %c0_10 = arith.constant 0 : index
    %19 = vector.load %arg0[%c0_8, %c0_9, %c0_10] : memref<2x128x4xf32, #tpu.memory_space<vmem>>, vector<2x128x4xf32>
    %20 = vector.shape_cast %19 : vector<2x128x4xf32> to vector<256x4xf32>
    %c0_11 = arith.constant 0 : index
    %c0_12 = arith.constant 0 : index
    %21 = vector.load %arg4[%c0_11, %c0_12] : memref<4x64xf32, #tpu.memory_space<vmem>>, vector<4x64xf32>
    %cst_13 = arith.constant dense<0.000000e+00> : vector<256x64xf32>
    %22 = tpu.matmul %20, %21, %cst_13 {dimension_numbers = #tpu.dot_dimension_numbers<[1], [0], [0], [1], [0, 0, 1, 1], [], []>} : vector<256x4xf32>, vector<4x64xf32>, vector<256x64xf32> -> vector<256x64xf32>
    %23 = vector.shape_cast %22 : vector<256x64xf32> to vector<2x128x64xf32>
    %c0_14 = arith.constant 0 : index
    %c0_15 = arith.constant 0 : index
    %24 = vector.load %arg5[%c0_14, %c0_15] : memref<128x64xf32, #tpu.memory_space<vmem>>, vector<128x64xf32>
    %25 = vector.shape_cast %24 : vector<128x64xf32> to vector<1x128x64xf32>
    %26 = vector.broadcast %25 : vector<1x128x64xf32> to vector<2x128x64xf32>
    %27 = arith.addf %23, %26 : vector<2x128x64xf32>
    %28 = vector.extract_strided_slice %27 {offsets = [0, 0, 0], sizes = [2, 128, 32], strides = [1, 1, 1]} : vector<2x128x64xf32> to vector<2x128x32xf32>
    %29 = vector.extract_strided_slice %27 {offsets = [0, 0, 32], sizes = [2, 128, 32], strides = [1, 1, 1]} : vector<2x128x64xf32> to vector<2x128x32xf32>
    "tpu.trace_start"() <{level = 10 : i32, message = "bmg,bng->bmn"}> : () -> ()
    %cst_16 = arith.constant dense<0.000000e+00> : vector<2x8x8xf32>
    %30 = tpu.matmul %16, %17, %cst_16 {dimension_numbers = #tpu.dot_dimension_numbers<[2], [2], [1], [1], [0, 0, 0, 1, 1, 1], [0], [0]>} : vector<2x8x32xf32>, vector<2x8x32xf32>, vector<2x8x8xf32> -> vector<2x8x8xf32>
    "tpu.trace_stop"() : () -> ()
    "tpu.trace_start"() <{level = 10 : i32, message = "bmg,bsg->bms"}> : () -> ()
    %cst_17 = arith.constant dense<0.000000e+00> : vector<2x8x128xf32>
    %31 = tpu.matmul %16, %28, %cst_17 {dimension_numbers = #tpu.dot_dimension_numbers<[2], [2], [1], [1], [0, 0, 0, 1, 1, 1], [0], [0]>} : vector<2x8x32xf32>, vector<2x128x32xf32>, vector<2x8x128xf32> -> vector<2x8x128xf32>
    "tpu.trace_stop"() : () -> ()
    %cst_18 = arith.constant dense<0xFF800000> : vector<2x8xf32>
    %32 = vector.multi_reduction <maximumf>, %30, %cst_18 [2] : vector<2x8x8xf32> to vector<2x8xf32>
    %33 = vector.shape_cast %32 : vector<2x8xf32> to vector<2x8x1xf32>
    %cst_19 = arith.constant dense<0xFF800000> : vector<2x8xf32>
    %34 = vector.multi_reduction <maximumf>, %31, %cst_19 [2] : vector<2x8x128xf32> to vector<2x8xf32>
    %35 = vector.shape_cast %34 : vector<2x8xf32> to vector<2x8x1xf32>
    %36 = arith.maximumf %33, %35 : vector<2x8x1xf32>
    %37 = vector.broadcast %36 : vector<2x8x1xf32> to vector<2x8x8xf32>
    %38 = arith.subf %30, %37 : vector<2x8x8xf32>
    %39 = math.exp %38 : vector<2x8x8xf32>
    %40 = vector.broadcast %36 : vector<2x8x1xf32> to vector<2x8x128xf32>
    %41 = arith.subf %31, %40 : vector<2x8x128xf32>
    %42 = math.exp %41 : vector<2x8x128xf32>
    %cst_20 = arith.constant dense<0.000000e+00> : vector<2x8xf32>
    %43 = vector.multi_reduction <add>, %39, %cst_20 [2] : vector<2x8x8xf32> to vector<2x8xf32>
    %44 = vector.shape_cast %43 : vector<2x8xf32> to vector<2x8x1xf32>
    %cst_21 = arith.constant dense<0.000000e+00> : vector<2x8xf32>
    %45 = vector.multi_reduction <add>, %42, %cst_21 [2] : vector<2x8x128xf32> to vector<2x8xf32>
    %46 = vector.shape_cast %45 : vector<2x8xf32> to vector<2x8x1xf32>
    %47 = arith.addf %44, %46 : vector<2x8x1xf32>
    "tpu.trace_start"() <{level = 10 : i32, message = "bmn,bng->bmg"}> : () -> ()
    %cst_22 = arith.constant dense<0.000000e+00> : vector<2x8x32xf32>
    %48 = tpu.matmul %39, %18, %cst_22 {dimension_numbers = #tpu.dot_dimension_numbers<[2], [1], [1], [2], [0, 0, 0, 1, 1, 2], [0], [0]>} : vector<2x8x8xf32>, vector<2x8x32xf32>, vector<2x8x32xf32> -> vector<2x8x32xf32>
    "tpu.trace_stop"() : () -> ()
    "tpu.trace_start"() <{level = 10 : i32, message = "bms,bsg->bmg"}> : () -> ()
    %cst_23 = arith.constant dense<0.000000e+00> : vector<2x8x32xf32>
    %49 = tpu.matmul %42, %29, %cst_23 {dimension_numbers = #tpu.dot_dimension_numbers<[2], [1], [1], [2], [0, 0, 0, 1, 1, 2], [0], [0]>} : vector<2x8x128xf32>, vector<2x128x32xf32>, vector<2x8x32xf32> -> vector<2x8x32xf32>
    "tpu.trace_stop"() : () -> ()
    %50 = arith.addf %48, %49 : vector<2x8x32xf32>
    %51 = tpu.reciprocal %47 {approx = true} : vector<2x8x1xf32> -> vector<2x8x1xf32>
    %52 = vector.broadcast %51 : vector<2x8x1xf32> to vector<2x8x32xf32>
    %53 = arith.mulf %50, %52 : vector<2x8x32xf32>
    %54 = vector.shape_cast %53 : vector<2x8x32xf32> to vector<16x32xf32>
    %c0_24 = arith.constant 0 : index
    %c0_25 = arith.constant 0 : index
    %c0_26 = arith.constant 0 : index
    %55 = vector.load %arg6[%c0_24, %c0_25, %c0_26] : memref<3x32x32xf32, #tpu.memory_space<vmem>>, vector<1x32x32xf32>
    %56 = vector.shape_cast %55 : vector<1x32x32xf32> to vector<32x32xf32>
    %cst_27 = arith.constant dense<0.000000e+00> : vector<16x32xf32>
    %57 = tpu.matmul %54, %56, %cst_27 {dimension_numbers = #tpu.dot_dimension_numbers<[1], [0], [0], [1], [0, 0, 1, 1], [], []>} : vector<16x32xf32>, vector<32x32xf32>, vector<16x32xf32> -> vector<16x32xf32>
    %58 = vector.broadcast %1 : vector<1x32xf32> to vector<16x32xf32>
    %59 = arith.addf %57, %58 : vector<16x32xf32>
    %c1 = arith.constant 1 : index
    %c0_28 = arith.constant 0 : index
    %c0_29 = arith.constant 0 : index
    %60 = vector.load %arg6[%c1, %c0_28, %c0_29] : memref<3x32x32xf32, #tpu.memory_space<vmem>>, vector<1x32x32xf32>
    %61 = vector.shape_cast %60 : vector<1x32x32xf32> to vector<32x32xf32>
    %cst_30 = arith.constant dense<0.000000e+00> : vector<16x32xf32>
    %62 = tpu.matmul %59, %61, %cst_30 {dimension_numbers = #tpu.dot_dimension_numbers<[1], [0], [0], [1], [0, 0, 1, 1], [], []>} : vector<16x32xf32>, vector<32x32xf32>, vector<16x32xf32> -> vector<16x32xf32>
    %63 = vector.broadcast %2 : vector<1x32xf32> to vector<16x32xf32>
    %64 = arith.addf %62, %63 : vector<16x32xf32>
    %cst_31 = arith.constant dense<0.000000e+00> : vector<32xf32>
    %65 = vector.multi_reduction <add>, %64, %cst_31 [0] : vector<16x32xf32> to vector<32xf32>
    %66 = vector.shape_cast %65 : vector<32xf32> to vector<1x32xf32>
    %cst_32 = arith.constant 6.250000e-02 : f32
    %67 = vector.broadcast %cst_32 : f32 to vector<1x32xf32>
    %68 = arith.mulf %66, %67 : vector<1x32xf32>
    %69 = vector.broadcast %68 : vector<1x32xf32> to vector<16x32xf32>
    %70 = arith.subf %64, %69 : vector<16x32xf32>
    %71 = arith.mulf %70, %70 : vector<16x32xf32>
    %cst_33 = arith.constant dense<0.000000e+00> : vector<32xf32>
    %72 = vector.multi_reduction <add>, %71, %cst_33 [0] : vector<16x32xf32> to vector<32xf32>
    %73 = vector.shape_cast %72 : vector<32xf32> to vector<1x32xf32>
    %cst_34 = arith.constant 6.250000e-02 : f32
    %74 = vector.broadcast %cst_34 : f32 to vector<1x32xf32>
    %75 = arith.mulf %73, %74 : vector<1x32xf32>
    %cst_35 = arith.constant 9.99999974E-6 : f32
    %76 = vector.broadcast %cst_35 : f32 to vector<1x32xf32>
    %77 = arith.addf %75, %76 : vector<1x32xf32>
    %78 = math.rsqrt %77 : vector<1x32xf32>
    %79 = vector.broadcast %78 : vector<1x32xf32> to vector<16x32xf32>
    %80 = arith.mulf %70, %79 : vector<16x32xf32>
    %81 = vector.broadcast %3 : vector<1x32xf32> to vector<16x32xf32>
    %82 = arith.mulf %80, %81 : vector<16x32xf32>
    %83 = vector.broadcast %4 : vector<1x32xf32> to vector<16x32xf32>
    %84 = arith.addf %82, %83 : vector<16x32xf32>
    %cst_36 = arith.constant 0.000000e+00 : f32
    %85 = vector.broadcast %cst_36 : f32 to vector<16x32xf32>
    %86 = arith.maximumf %84, %85 : vector<16x32xf32>
    %c2 = arith.constant 2 : index
    %c0_37 = arith.constant 0 : index
    %c0_38 = arith.constant 0 : index
    %87 = vector.load %arg6[%c2, %c0_37, %c0_38] : memref<3x32x32xf32, #tpu.memory_space<vmem>>, vector<1x32x32xf32>
    %88 = vector.shape_cast %87 : vector<1x32x32xf32> to vector<32x32xf32>
    %cst_39 = arith.constant dense<0.000000e+00> : vector<16x32xf32>
    %89 = tpu.matmul %86, %88, %cst_39 {dimension_numbers = #tpu.dot_dimension_numbers<[1], [0], [0], [1], [0, 0, 1, 1], [], []>} : vector<16x32xf32>, vector<32x32xf32>, vector<16x32xf32> -> vector<16x32xf32>
    %90 = vector.broadcast %5 : vector<1x32xf32> to vector<16x32xf32>
    %91 = arith.addf %89, %90 : vector<16x32xf32>
    %cst_40 = arith.constant dense<0.000000e+00> : vector<32xf32>
    %92 = vector.multi_reduction <add>, %91, %cst_40 [0] : vector<16x32xf32> to vector<32xf32>
    %93 = vector.shape_cast %92 : vector<32xf32> to vector<1x32xf32>
    %cst_41 = arith.constant 6.250000e-02 : f32
    %94 = vector.broadcast %cst_41 : f32 to vector<1x32xf32>
    %95 = arith.mulf %93, %94 : vector<1x32xf32>
    %96 = vector.broadcast %95 : vector<1x32xf32> to vector<16x32xf32>
    %97 = arith.subf %91, %96 : vector<16x32xf32>
    %98 = arith.mulf %97, %97 : vector<16x32xf32>
    %cst_42 = arith.constant dense<0.000000e+00> : vector<32xf32>
    %99 = vector.multi_reduction <add>, %98, %cst_42 [0] : vector<16x32xf32> to vector<32xf32>
    %100 = vector.shape_cast %99 : vector<32xf32> to vector<1x32xf32>
    %cst_43 = arith.constant 6.250000e-02 : f32
    %101 = vector.broadcast %cst_43 : f32 to vector<1x32xf32>
    %102 = arith.mulf %100, %101 : vector<1x32xf32>
    %cst_44 = arith.constant 9.99999974E-6 : f32
    %103 = vector.broadcast %cst_44 : f32 to vector<1x32xf32>
    %104 = arith.addf %102, %103 : vector<1x32xf32>
    %105 = math.rsqrt %104 : vector<1x32xf32>
    %106 = vector.broadcast %105 : vector<1x32xf32> to vector<16x32xf32>
    %107 = arith.mulf %97, %106 : vector<16x32xf32>
    %108 = vector.broadcast %6 : vector<1x32xf32> to vector<16x32xf32>
    %109 = arith.mulf %107, %108 : vector<16x32xf32>
    %110 = vector.broadcast %7 : vector<1x32xf32> to vector<16x32xf32>
    %111 = arith.addf %109, %110 : vector<16x32xf32>
    %cst_45 = arith.constant 0.000000e+00 : f32
    %112 = vector.broadcast %cst_45 : f32 to vector<16x32xf32>
    %113 = arith.maximumf %111, %112 : vector<16x32xf32>
    %114 = vector.shape_cast %113 : vector<16x32xf32> to vector<2x8x32xf32>
    %c0_46 = arith.constant 0 : index
    %c0_47 = arith.constant 0 : index
    %c0_48 = arith.constant 0 : index
    %115 = vector.load %arg8[%c0_46, %c0_47, %c0_48] : memref<2x8x32xf32, #tpu.memory_space<vmem>>, vector<2x8x32xf32>
    tpu.vector_store %arg8[%c0_46, %c0_47, %c0_48], %114 {strides = array<i32>} : memref<2x8x32xf32, #tpu.memory_space<vmem>>, vector<2x8x32xf32>,
    return
  }
}

</mosaic_0001>

<bundles_post_ra>
// kernel: tpu_custom_call.1
= control target key start
LH: loop header
LB: loop body
LE: loop exit
PB: predicated region body
PF: predicated region fallthrough
CT: control target
= control target key end

     0   :  { %vm256_vm0 = vcmask 1043456   ;;  %vm159_vm1 = vcmask 31744   ;;  %vm44_vm2 = vcmask 261120   ;;  %s3113_s0 = inlined_call_operand.vmem [shape: f32[2,128,4], index: 0, kind: input, shape index: {}]   ;;  %s3114_s1 = inlined_call_operand.vmem [shape: f32[2,8,32], index: 1, kind: input, shape index: {}]   ;;  %s3115_s2 = inlined_call_operand.vmem [shape: f32[32,96], index: 2, kind: input, shape index: {}]   ;;  %s3116_s3 = inlined_call_operand.vmem [shape: f32[1,96], index: 3, kind: input, shape index: {}]   ;;  %s3117_s4 = inlined_call_operand.vmem [shape: f32[4,64], index: 4, kind: input, shape index: {}]   ;;  %s3118_s5 = inlined_call_operand.vmem [shape: f32[128,64], index: 5, kind: input, shape index: {}]   ;;  %s3119_s6 = inlined_call_operand.vmem [shape: f32[3,32,32], index: 6, kind: input, shape index: {}]   ;;  %s3120_s7 = inlined_call_operand.vmem [shape: f32[7,32], index: 7, kind: input, shape index: {}]   ;;  %s3121_s8 = inlined_call_operand.hbm [shape: f32[2,8,32], index: 8, kind: output, shape index: {}]  }
   0x1   :  { %v158_v0 = vld [vmem:[%s3117_s4] sm:$0xf]  ;;  %v34_v3 = vld [vmem:[%s3115_s2 + $0x8] sm:$0xff]  ;;  %v35_v5 = vld [vmem:[%s3115_s2 + $0x10] sm:$0xff] }
   0x2   :  { %v126_v1 = vld [vmem:[%s3113_s0] sm:$0xff]  ;;  %1957 = vmatprep.subr.msk.mxu1 %vm256_vm0, %v158_v0  ;;  %v127_v4 = vld [vmem:[%s3113_s0 + $0x8] sm:$0xff]  ;;  %v36_v7 = vld [vmem:[%s3115_s2 + $0x18] sm:$0xff] }
   0x3   :  { %v33_v2 = vld [vmem:[%s3115_s2] sm:$0xff]  ;;  %1959 = vmatprep.mubr.msk.f32.mxu1 %vm159_vm1, %v126_v1  ;;  %1958 = vmatpush3.msk.msra.mxu1 %vm256_vm0, %v158_v0  ;;  %v128_v9 = vld [vmem:[%s3113_s0 + $0x10] sm:$0xff]  ;;  %v2204_v10 = vpack.c.bf16 %v36_v7, %v35_v5  ;;  %v129_v11 = vld [vmem:[%s3113_s0 + $0x18] sm:$0xff] }
   0x4   :  { %v2200_v6 = vpack.c.bf16 %v34_v3, %v33_v2  ;;  %v31_v8 = vld [vmem:[%s3114_s1] sm:$0xff]  ;;  %1960 = vmatmul.mubr.msk.f32.vlgmr.msra.gmra.mrb[0].mxu1 %vm159_vm1, %v127_v4  ;;  %v131_v13 = vld [vmem:[%s3113_s0 + $0x28] sm:$0xff]  ;;  %v132_v15 = vld [vmem:[%s3113_s0 + $0x30] sm:$0xff] }
   0x5   :  { %1954 = vmatprep.mubr.msk.f32.mxu0 %vm44_vm2, %v31_v8  ;;  %1962 = vmatprep.mubr.msk.f32.mxu1 %vm159_vm1, %v128_v9  ;;  %v130_v12 = vld [vmem:[%s3113_s0 + $0x20] sm:$0xff]  ;;  %v32_v14 = vld [vmem:[%s3114_s1 + $0x8] sm:$0xff]  ;;  %v133_v16 = vld [vmem:[%s3113_s0 + $0x38] sm:$0xff] }
   0x6   :  { %2201 = vmatprep.subr.bf16.mxu0 %v2200_v6  ;;  %v134_v17 = vld [vmem:[%s3113_s0 + $0x40] sm:$0xff] }
   0x7   :  { %2203 = vmatpush3.bf16.msra.mxu0 %v2200_v6 }
   0x8   :  { %2205 = vmatprep.subr.bf16.mxu0 %v2204_v10  ;;  %1963 = vmatmul.mubr.msk.f32.gmra.mrb[2].mxu1 %vm159_vm1, %v129_v11 }
   0x9   :  { %1965 = vmatprep.mubr.msk.f32.mxu1 %vm159_vm1, %v130_v12 }
   0xb   :  { %2207 = vmatpush3.bf16.msra.mxu0 %v2204_v10 }
   0xc   :  { %1966 = vmatmul.mubr.msk.f32.gmra.mrb[4].mxu1 %vm159_vm1, %v131_v13 }
   0xd   :  { %1968 = vmatprep.mubr.msk.f32.mxu1 %vm159_vm1, %v132_v15 }
   0xe   :  { %1955 = vmatmul.mubr.msk.f32.vlgmr.msra.gmra.mrb[0].mxu0 %vm44_vm2, %v32_v14 }
   0xf   :  { %13 = vsyncpa [#allocation3], 0  ;;  %v135_v18 = vld [vmem:[%s3113_s0 + $0x48] sm:$0xff]  ;;  %v136_v19 = vld [vmem:[%s3113_s0 + $0x50] sm:$0xff]  ;;  %v2475_v41 = vmov 0.0|0.0   ;;  %vm2476_vm3 = vmmov 0  }
  0x10   :  { %1969 = vmatmul.mubr.msk.f32.gmra.mrb[6].mxu1 %vm159_vm1, %v133_v16  ;;  %v137_v20 = vld [vmem:[%s3113_s0 + $0x58] sm:$0xff]  ;;  %v138_v21 = vld [vmem:[%s3113_s0 + $0x60] sm:$0xff]  ;;  %v139_v22 = vld [vmem:[%s3113_s0 + $0x68] sm:$0xff]  ;;  %2208 = vmatprep.subr.bf16.mxu1 %v2475_v41  ;;  %v2477_v42 = vmov 0.0   ;;  %s2478_s16 = smov 96   ;;  %vm923_vm5 = vcmask 64512  }
  0x11   :  { %1971 = vmatprep.mubr.msk.f32.mxu1 %vm159_vm1, %v134_v17  ;;  %v140_v23 = vld [vmem:[%s3113_s0 + $0x70] sm:$0xff]  ;;  %v141_v24 = vld [vmem:[%s3113_s0 + $0x78] sm:$0xff]  ;;  %v142_v25 = vld [vmem:[%s3113_s0 + $0x80] sm:$0xff]  ;;  %2007 = vmatprep.subr.mxu0 %v2477_v42 }
  0x12   :  { %v143_v26 = vld [vmem:[%s3113_s0 + $0x88] sm:$0xff]  ;;  %v144_v27 = vld [vmem:[%s3113_s0 + $0x90] sm:$0xff]  ;;  %v145_v28 = vld [vmem:[%s3113_s0 + $0x98] sm:$0xff]  ;;  %2009 = vmatprep.mubr.msk.f32.mxu0 %vm2476_vm3, %v2477_v42 }
  0x13   :  { %v146_v29 = vld [vmem:[%s3113_s0 + $0xa0] sm:$0xff]  ;;  %v147_v30 = vld [vmem:[%s3113_s0 + $0xa8] sm:$0xff]  ;;  %v148_v31 = vld [vmem:[%s3113_s0 + $0xb0] sm:$0xff] }
  0x14   :  { %1972 = vmatmul.mubr.msk.f32.gmra.mrb[8].mxu1 %vm159_vm1, %v135_v18  ;;  %v149_v32 = vld [vmem:[%s3113_s0 + $0xb8] sm:$0xff]  ;;  %v150_v33 = vld [vmem:[%s3113_s0 + $0xc0] sm:$0xff]  ;;  %v151_v34 = vld [vmem:[%s3113_s0 + $0xc8] sm:$0xff] }
  0x15   :  { %1974 = vmatprep.mubr.msk.f32.mxu1 %vm159_vm1, %v136_v19  ;;  %v152_v35 = vld [vmem:[%s3113_s0 + $0xd0] sm:$0xff]  ;;  %v153_v36 = vld [vmem:[%s3113_s0 + $0xd8] sm:$0xff]  ;;  %v154_v37 = vld [vmem:[%s3113_s0 + $0xe0] sm:$0xff] }
  0x16   :  { %v155_v38 = vld [vmem:[%s3113_s0 + $0xe8] sm:$0xff]  ;;  %v156_v39 = vld [vmem:[%s3113_s0 + $0xf0] sm:$0xff]  ;;  %v157_v40 = vld [vmem:[%s3113_s0 + $0xf8] sm:$0xff] }
  0x17   :  { %v2688_v43 = vld [vmem:[%s3118_s5 + $0x8] sm:$0xff]  ;;  %v2693_v44 = vld [vmem:[%s3118_s5] sm:$0xff]  ;;  %v2700_v49 = vld [vmem:[%s3118_s5 + $0x18] sm:$0xff] }
  0x18   :  { %1975 = vmatmul.mubr.msk.f32.gmra.mrb[10].mxu1 %vm159_vm1, %v137_v20  ;;  %vm2704_vm4 = vmpackc.low %vm44_vm2, %vm44_vm2  ;;  %v2711_v51 = vld [vmem:[%s3118_s5 + $0x10] sm:$0xff]  ;;  %v2720_v58 = vld [vmem:[%s3118_s5 + $0x28] sm:$0xff] }
  0x19   :  { %1977 = vmatprep.mubr.msk.f32.mxu1 %vm159_vm1, %v138_v21  ;;  %v2727_v59 = vld [vmem:[%s3118_s5 + $0x20] sm:$0xff]  ;;  %v2737_v5 = vld [vmem:[%s3118_s5 + $0x38] sm:$0xff]  ;;  %v2744_v7 = vld [vmem:[%s3118_s5 + $0x30] sm:$0xff] }
  0x1a   :  { %v1723_v60 = vld [vmem:[%s3116_s3] ss:$0 sm:$0xff]  ;;  %v2755_v14 = vld [vmem:[%s3118_s5 + $0x48] sm:$0xff] }
  0x1b   :  { %v2764_v16 = vld [vmem:[%s3118_s5 + $0x40] sm:$0xff] }
  0x1c   :  { %1978 = vmatmul.mubr.msk.f32.gmra.mrb[12].mxu1 %vm159_vm1, %v139_v22 }
  0x1d   :  { %1980 = vmatprep.mubr.msk.f32.mxu1 %vm159_vm1, %v140_v23  ;;  %v2773_v23 = vld [vmem:[%s3118_s5 + $0x58] sm:$0xff] }
  0x20   :  { %1981 = vmatmul.mubr.msk.f32.gmra.mrb[14].mxu1 %vm159_vm1, %v141_v24  ;;  %v2779_v24 = vld [vmem:[%s3118_s5 + $0x50] sm:$0xff] }
  0x21   :  { %1983 = vmatprep.mubr.msk.f32.mxu1 %vm159_vm1, %v142_v25 }
  0x24   :  { %1984 = vmatmul.mubr.msk.f32.gmra.mrb[16].mxu1 %vm159_vm1, %v143_v26 }
  0x25   :  { %1986 = vmatprep.mubr.msk.f32.mxu1 %vm159_vm1, %v144_v27 }
  0x28   :  { %1987 = vmatmul.mubr.msk.f32.gmra.mrb[18].mxu1 %vm159_vm1, %v145_v28 }
  0x29   :  { %1989 = vmatprep.mubr.msk.f32.mxu1 %vm159_vm1, %v146_v29 }
  0x2c   :  { %1990 = vmatmul.mubr.msk.f32.gmra.mrb[20].mxu1 %vm159_vm1, %v147_v30 }
  0x2d   :  { %1992 = vmatprep.mubr.msk.f32.mxu1 %vm159_vm1, %v148_v31  ;;  %v2789_v31 = vld [vmem:[%s3118_s5 + $0x68] sm:$0xff] }
  0x30   :  { %1993 = vmatmul.mubr.msk.f32.gmra.mrb[22].mxu1 %vm159_vm1, %v149_v32  ;;  %v2795_v32 = vld [vmem:[%s3118_s5 + $0x60] sm:$0xff] }
  0x31   :  { %1995 = vmatprep.mubr.msk.f32.mxu1 %vm159_vm1, %v150_v33 }
  0x34   :  { %1996 = vmatmul.mubr.msk.f32.gmra.mrb[24].mxu1 %vm159_vm1, %v151_v34 }
  0x35   :  { %1998 = vmatprep.mubr.msk.f32.mxu1 %vm159_vm1, %v152_v35 }
  0x38   :  { %1999 = vmatmul.mubr.msk.f32.gmra.mrb[26].mxu1 %vm159_vm1, %v153_v36 }
  0x39   :  { %2001 = vmatprep.mubr.msk.f32.mxu1 %vm159_vm1, %v154_v37 }
  0x3c   :  { %2002 = vmatmul.mubr.msk.f32.gmra.mrb[28].mxu1 %vm159_vm1, %v155_v38 }
  0x3d   :  { %2004 = vmatprep.mubr.msk.f32.mxu1 %vm159_vm1, %v156_v39  ;;  %v2803_v39 = vld [vmem:[%s3118_s5 + $0x78] sm:$0xff] }
  0x40   :  { %2005 = vmatmul.mubr.msk.f32.gmra.mrb[30].mxu1 %vm159_vm1, %v157_v40  ;;  %v2809_v40 = vld [vmem:[%s3118_s5 + $0x70] sm:$0xff]  ;;  %s2479_s5 = smov 64  }
  0x41   :  { %2049 = vmatprep.mubr.msk.f32.mxu1 %vm2476_vm3, %v2477_v42 }
  0xd7   :  { %v1961_v45 = vpop.f32.mrb[0].mxu1 }
  0xd8   :  { %v502_v46 = vadd.f32 %v1961_v45, %v2688_v43  ;;  %v326_v47 = vpop.f32.mrb[1].mxu1 }
  0xd9   :  { %v501_v48 = vadd.f32 %v2693_v44, %v326_v47 }
  0xdb   :  { %v2209_v52 = vpack.c.bf16 %v502_v46, %v501_v48  ;;  %v1964_v53 = vpop.f32.mrb[2].mxu1  ;;  %v2355_v54 = vpack.i.bf16 %v502_v46, %v501_v48 }
  0xdc   :  { %v504_v55 = vadd.f32 %v1964_v53, %v2700_v49  ;;  %v336_v56 = vpop.f32.mrb[3].mxu1 }
  0xdd   :  { %2211 = vmatpush3.bf16.xpose.msk.msra.mxu1 %vm2704_vm4, %v2209_v52  ;;  %v503_v57 = vadd.f32 %v2711_v51, %v336_v56  ;;  %2356 = vrot.lane.b32.xlu1 %v2355_v54, %s2478_s16 }
  0xde   :  { %2212 = vmatprep.subr.bf16.mxu1 %v2475_v41 }
  0xdf   :  { %v2360_v61 = vpack.i.bf16 %v504_v55, %v503_v57  ;;  %v2213_v62 = vpack.c.bf16 %v504_v55, %v503_v57  ;;  %v1967_v63 = vpop.f32.mrb[4].mxu1 }
  0xe0   :  { %v506_v1 = vadd.f32 %v1967_v63, %v2720_v58  ;;  %v346_v2 = vpop.f32.mrb[5].mxu1 }
  0xe1   :  { %v1956_v0 = vpop.f32.mrb[0].mxu0  ;;  %v505_v4 = vadd.f32 %v2727_v59, %v346_v2 }
  0xe2   :  { %v117_v3 = vpop.f32.mrb[1].mxu0  ;;  %v2758_v15 = vadd.f32 %v1956_v0, %v1723_v60 }
  0xe3   :  { %v2739_v6 = vadd.f32 %v1723_v60, %v117_v3  ;;  %v2365_v8 = vpack.i.bf16 %v506_v1, %v505_v4  ;;  %v2217_v9 = vpack.c.bf16 %v506_v1, %v505_v4  ;;  %v1970_v10 = vpop.f32.mrb[6].mxu1 }
  0xe4   :  { %v508_v11 = vadd.f32 %v1970_v10, %v2737_v5  ;;  %v356_v12 = vpop.f32.mrb[7].mxu1 }
  0xe5   :  { %534 = vrot.lane.b32.xlu0 %v2739_v6, %s2478_s16  ;;  %2215 = vmatpush3.bf16.xpose.msk.msra.mxu1 %vm2704_vm4, %v2213_v62  ;;  %v507_v13 = vadd.f32 %v2744_v7, %v356_v12 }
  0xe6   :  { %2366 = vrot.lane.b32.xlu1 %v2365_v8, %s2478_s16  ;;  %2216 = vmatprep.subr.bf16.mxu1 %v2475_v41 }
  0xe7   :  { %v2370_v17 = vpack.i.bf16 %v508_v11, %v507_v13  ;;  %v2221_v18 = vpack.c.bf16 %v508_v11, %v507_v13  ;;  %v1973_v19 = vpop.f32.mrb[8].mxu1 }
  0xe8   :  { %v510_v20 = vadd.f32 %v1973_v19, %v2755_v14  ;;  %v366_v21 = vpop.f32.mrb[9].mxu1 }
  0xe9   :  { %611 = vrot.lane.b32.xlu0 %v2758_v15, %s2478_s16  ;;  %v509_v22 = vadd.f32 %v2764_v16, %v366_v21 }
  0xea   :  { %2371 = vrot.lane.b32.xlu1 %v2370_v17, %s2478_s16 }
  0xeb   :  { %v2375_v25 = vpack.i.bf16 %v510_v20, %v509_v22  ;;  %v2225_v26 = vpack.c.bf16 %v510_v20, %v509_v22  ;;  %v1976_v27 = vpop.f32.mrb[10].mxu1 }
  0xec   :  { %v512_v28 = vadd.f32 %v1976_v27, %v2773_v23  ;;  %v376_v29 = vpop.f32.mrb[11].mxu1 }
  0xed   :  { %2361 = vrot.lane.b32.xlu0 %v2360_v61, %s2478_s16  ;;  %2219 = vmatpush3.bf16.xpose.msk.msra.mxu1 %vm2704_vm4, %v2217_v9  ;;  %v511_v30 = vadd.f32 %v2779_v24, %v376_v29 }
  0xee   :  { %2220 = vmatprep.subr.bf16.mxu1 %v2475_v41 }
  0xef   :  { %v2380_v33 = vpack.i.bf16 %v512_v28, %v511_v30  ;;  %v2229_v34 = vpack.c.bf16 %v512_v28, %v511_v30  ;;  %v1979_v35 = vpop.f32.mrb[12].mxu1 }
  0xf0   :  { %v514_v36 = vadd.f32 %v1979_v35, %v2789_v31  ;;  %v386_v37 = vpop.f32.mrb[13].mxu1 }
  0xf1   :  { %2376 = vrot.lane.b32.xlu0 %v2375_v25, %s2478_s16  ;;  %v513_v38 = vadd.f32 %v2795_v32, %v386_v37  ;;  %2381 = vrot.lane.b32.xlu1 %v2380_v33, %s2478_s16 }
  0xf3   :  { %v2385_v45 = vpack.i.bf16 %v514_v36, %v513_v38  ;;  %v2233_v46 = vpack.c.bf16 %v514_v36, %v513_v38  ;;  %v1982_v47 = vpop.f32.mrb[14].mxu1 }
  0xf4   :  { %v2812_v48 = vadd.f32 %v1982_v47, %v2803_v39  ;;  %v396_v52 = vpop.f32.mrb[15].mxu1 }
  0xf5   :  { %2223 = vmatpush3.bf16.xpose.msk.msra.mxu1 %vm2704_vm4, %v2221_v18  ;;  %v2817_v53 = vadd.f32 %v2809_v40, %v396_v52  ;;  %2386 = vrot.lane.b32.xlu1 %v2385_v45, %s2478_s16 }
  0xf6   :  { %2224 = vmatprep.subr.bf16.mxu1 %v2475_v41 }
  0xf7   :  { %v2390_v54 = vpack.i.bf16 %v2812_v48, %v2817_v53  ;;  %v2237_v55 = vpack.c.bf16 %v2812_v48, %v2817_v53  ;;  %v1985_v56 = vpop.f32.mrb[16].mxu1 }
  0xf8   :  { %v2826_v57 = vadd.f32 %v1985_v56, %v2688_v43  ;;  %v406_v60 = vpop.f32.mrb[17].mxu1 }
  0xf9   :  { %v2829_v61 = vadd.f32 %v2693_v44, %v406_v60  ;;  %2391 = vrot.lane.b32.xlu1 %v2390_v54, %s2478_s16 }
  0xfb   :  { %v2395_v62 = vpack.i.bf16 %v2826_v57, %v2829_v61  ;;  %v2241_v63 = vpack.c.bf16 %v2826_v57, %v2829_v61  ;;  %v1988_v0 = vpop.f32.mrb[18].mxu1 }
  0xfc   :  { %v2837_v1 = vadd.f32 %v1988_v0, %v2700_v49  ;;  %v416_v2 = vpop.f32.mrb[19].mxu1 }
  0xfd   :  { %2227 = vmatpush3.bf16.xpose.msk.msra.mxu1 %vm2704_vm4, %v2225_v26  ;;  %2396 = vrot.lane.b32.xlu0 %v2395_v62, %s2478_s16  ;;  %v2843_v43 = vadd.f32 %v2711_v51, %v416_v2 }
  0xfe   :  { %2228 = vmatprep.subr.bf16.mxu1 %v2475_v41 }
  0xff   :  { %v2400_v44 = vpack.i.bf16 %v2837_v1, %v2843_v43  ;;  %v2245_v3 = vpack.c.bf16 %v2837_v1, %v2843_v43  ;;  %v1991_v4 = vpop.f32.mrb[20].mxu1 }
 0x100   :  { %v2851_v49 = vadd.f32 %v1991_v4, %v2720_v58  ;;  %v426_v8 = vpop.f32.mrb[21].mxu1 }
 0x101   :  { %2401 = vrot.lane.b32.xlu1 %v2400_v44, %s2478_s16  ;;  %v2855_v9 = vadd.f32 %v2727_v59, %v426_v8 }
 0x103   :  { %v2405_v51 = vpack.i.bf16 %v2851_v49, %v2855_v9  ;;  %v2249_v10 = vpack.c.bf16 %v2851_v49, %v2855_v9  ;;  %v1994_v11 = vpop.f32.mrb[22].mxu1 }
 0x104   :  { %v2862_v12 = vadd.f32 %v1994_v11, %v2737_v5  ;;  %v436_v13 = vpop.f32.mrb[23].mxu1 }
 0x105   :  { %2231 = vmatpush3.bf16.xpose.msk.msra.mxu1 %vm2704_vm4, %v2229_v34  ;;  %2406 = vrot.lane.b32.xlu0 %v2405_v51, %s2478_s16  ;;  %v2868_v58 = vadd.f32 %v2744_v7, %v436_v13 }
 0x106   :  { %2232 = vmatprep.subr.bf16.mxu1 %v2475_v41 }
 0x107   :  { %v2410_v59 = vpack.i.bf16 %v2862_v12, %v2868_v58  ;;  %v2253_v17 = vpack.c.bf16 %v2862_v12, %v2868_v58  ;;  %v1997_v18 = vpop.f32.mrb[24].mxu1 }
 0x108   :  { %v2876_v5 = vadd.f32 %v1997_v18, %v2755_v14  ;;  %v446_v19 = vpop.f32.mrb[25].mxu1 }
 0x109   :  { %2411 = vrot.lane.b32.xlu0 %v2410_v59, %s2478_s16  ;;  %v2880_v20 = vadd.f32 %v2764_v16, %v446_v19 }
 0x10b   :  { %v2415_v7 = vpack.i.bf16 %v2876_v5, %v2880_v20  ;;  %v2257_v21 = vpack.c.bf16 %v2876_v5, %v2880_v20  ;;  %v2000_v22 = vpop.f32.mrb[26].mxu1 }
 0x10c   :  { %v2887_v25 = vadd.f32 %v2000_v22, %v2773_v23  ;;  %v456_v26 = vpop.f32.mrb[27].mxu1 }
 0x10d   :  { %2235 = vmatpush3.bf16.xpose.msk.msra.mxu1 %vm2704_vm4, %v2233_v46  ;;  %2416 = vrot.lane.b32.xlu0 %v2415_v7, %s2478_s16  ;;  %v2893_v14 = vadd.f32 %v2779_v24, %v456_v26 }
 0x10e   :  { %2236 = vmatprep.subr.bf16.mxu1 %v2475_v41 }
 0x10f   :  { %v2420_v16 = vpack.i.bf16 %v2887_v25, %v2893_v14  ;;  %v2261_v27 = vpack.c.bf16 %v2887_v25, %v2893_v14  ;;  %v2003_v28 = vpop.f32.mrb[28].mxu1 }
 0x110   :  { %v2901_v23 = vadd.f32 %v2003_v28, %v2789_v31  ;;  %v466_v29 = vpop.f32.mrb[29].mxu1 }
 0x111   :  { %2421 = vrot.lane.b32.xlu1 %v2420_v16, %s2478_s16  ;;  %v2905_v30 = vadd.f32 %v2795_v32, %v466_v29 }
 0x113   :  { %v2425_v24 = vpack.i.bf16 %v2901_v23, %v2905_v30  ;;  %v2265_v33 = vpack.c.bf16 %v2901_v23, %v2905_v30  ;;  %v2006_v34 = vpop.f32.mrb[30].mxu1 }
 0x114   :  { %v2912_v35 = vadd.f32 %v2006_v34, %v2803_v39  ;;  %v476_v36 = vpop.f32.mrb[31].mxu1 }
 0x115   :  { %2239 = vmatpush3.bf16.xpose.msk.msra.mxu1 %vm2704_vm4, %v2237_v55  ;;  %v2917_v31 = vadd.f32 %v2809_v40, %v476_v36 }
 0x116   :  { %2272 = vmatprep.subr.bf16.mxu1 %v2475_v41 }
 0x117   :  { %v2430_v32 = vpack.i.bf16 %v2912_v35, %v2917_v31  ;;  %v2269_v37 = vpack.c.bf16 %v2912_v35, %v2917_v31 }
 0x11c   :  { %2050 = vmatmul.mubr.msk.f32.vlgmr.msra.gmra.mrb[32].mxu1 %vm44_vm2, %v2739_v6 }
 0x11d   :  { %2119 = vmatprep.mubr.msk.f32.mxu1 %vm2476_vm3, %v2477_v42 }
 0x14f   :  { %v2357_v38 = vpop.permute.xlu1 %2356 }
 0x150   :  { %v2359_v39 = vunpack.i.h.bf16 %v2357_v38  ;;  %v2358_v45 = vunpack.i.l.bf16 %v2357_v38 }
 0x152   :  { %v2273_v46 = vpack.c.bf16 %v2359_v39, %v2358_v45 }
 0x154   :  { %2274 = vmatpush3.bf16.msra.mxu1 %v2273_v46 }
 0x155   :  { %2275 = vmatprep.subr.bf16.mxu1 %v2475_v41 }
 0x157   :  { %v535_v40 = vpop.permute.xlu0 %534 }
 0x158   :  { %2008 = vmatpush3.xpose.msk.msra.mxu0 %vm44_vm2, %v535_v40  ;;  %v2367_v48 = vpop.permute.xlu1 %2366 }
 0x159   :  { %2012 = vmatprep.subr.mxu0 %v2477_v42  ;;  %v2369_v55 = vunpack.i.h.bf16 %v2367_v48  ;;  %v2368_v56 = vunpack.i.l.bf16 %v2367_v48 }
 0x15b   :  { %2010 = vmatmul.mubr.msk.f32.vlgmr.msra.gmra.mrb[2].mxu0 %vm44_vm2, %v2739_v6  ;;  %v612_v47 = vpop.permute.xlu0 %611  ;;  %v2279_v0 = vpack.c.bf16 %v2369_v55, %v2368_v56 }
 0x15c   :  { %2013 = vmatpush3.xpose.msk.msra.mxu0 %vm44_vm2, %v612_v47  ;;  %2014 = vmatprep.mubr.msk.f32.mxu0 %vm2476_vm3, %v2477_v42  ;;  %v2372_v60 = vpop.permute.xlu1 %2371 }
 0x15d   :  { %2240 = vmatprep.subr.bf16.mxu0 %v2475_v41  ;;  %v2374_v2 = vunpack.i.h.bf16 %v2372_v60  ;;  %v2373_v44 = vunpack.i.l.bf16 %v2372_v60 }
 0x15f   :  { %2015 = vmatmul.mubr.msk.f32.vlgmr.msra.gmra.mrb[4].mxu0 %vm44_vm2, %v2758_v15  ;;  %v2362_v52 = vpop.permute.xlu0 %2361 }
 0x160   :  { %2243 = vmatpush3.bf16.xpose.msk.msra.mxu0 %vm2704_vm4, %v2241_v63  ;;  %2084 = vmatprep.mubr.msk.f32.mxu0 %vm2476_vm3, %v2477_v42  ;;  %v2364_v53 = vunpack.i.h.bf16 %v2362_v52  ;;  %v2363_v54 = vunpack.i.l.bf16 %v2362_v52  ;;  %v2282_v63 = vpack.c.bf16 %v2374_v2, %v2373_v44 }
 0x161   :  { %2244 = vmatprep.subr.bf16.mxu0 %v2475_v41 }
 0x162   :  { %v2276_v62 = vpack.c.bf16 %v2364_v53, %v2363_v54 }
 0x163   :  { %v2377_v57 = vpop.permute.xlu0 %2376  ;;  %v2382_v61 = vpop.permute.xlu1 %2381 }
 0x164   :  { %2277 = vmatpush3.bf16.msra.mxu1 %v2276_v62  ;;  %v2379_v4 = vunpack.i.h.bf16 %v2377_v57  ;;  %v2378_v8 = vunpack.i.l.bf16 %v2377_v57  ;;  %v2384_v13 = vunpack.i.h.bf16 %v2382_v61  ;;  %v2383_v59 = vunpack.i.l.bf16 %v2382_v61 }
 0x165   :  { %2278 = vmatprep.subr.bf16.mxu1 %v2475_v41 }
 0x166   :  { %v2285_v11 = vpack.c.bf16 %v2379_v4, %v2378_v8  ;;  %v2288_v1 = vpack.c.bf16 %v2384_v13, %v2383_v59 }
 0x167   :  { %v2387_v51 = vpop.permute.xlu1 %2386 }
 0x168   :  { %2247 = vmatpush3.bf16.xpose.msk.msra.mxu0 %vm2704_vm4, %v2245_v3  ;;  %2280 = vmatpush3.bf16.msra.mxu1 %v2279_v0  ;;  %v2389_v43 = vunpack.i.h.bf16 %v2387_v51  ;;  %v2388_v3 = vunpack.i.l.bf16 %v2387_v51 }
 0x169   :  { %2248 = vmatprep.subr.bf16.mxu0 %v2475_v41  ;;  %2281 = vmatprep.subr.bf16.mxu1 %v2475_v41 }
 0x16a   :  { %v2291_v19 = vpack.c.bf16 %v2389_v43, %v2388_v3 }
 0x16b   :  { %v2392_v18 = vpop.permute.xlu1 %2391 }
 0x16c   :  { %2283 = vmatpush3.bf16.msra.mxu1 %v2282_v63  ;;  %v2394_v7 = vunpack.i.h.bf16 %v2392_v18  ;;  %v2393_v22 = vunpack.i.l.bf16 %v2392_v18 }
 0x16d   :  { %2284 = vmatprep.subr.bf16.mxu1 %v2475_v41 }
 0x16e   :  { %v2294_v49 = vpack.c.bf16 %v2394_v7, %v2393_v22 }
 0x16f   :  { %v2397_v9 = vpop.permute.xlu0 %2396 }
 0x170   :  { %2251 = vmatpush3.bf16.xpose.msk.msra.mxu0 %vm2704_vm4, %v2249_v10  ;;  %2286 = vmatpush3.bf16.msra.mxu1 %v2285_v11  ;;  %v2399_v10 = vunpack.i.h.bf16 %v2397_v9  ;;  %v2398_v12 = vunpack.i.l.bf16 %v2397_v9 }
 0x171   :  { %2252 = vmatprep.subr.bf16.mxu0 %v2475_v41  ;;  %2287 = vmatprep.subr.bf16.mxu1 %v2475_v41 }
 0x173   :  { %v2402_v58 = vpop.permute.xlu1 %2401 }
 0x174   :  { %2289 = vmatpush3.bf16.msra.mxu1 %v2288_v1  ;;  %v2404_v5 = vunpack.i.h.bf16 %v2402_v58  ;;  %v2403_v20 = vunpack.i.l.bf16 %v2402_v58 }
 0x175   :  { %2290 = vmatprep.subr.bf16.mxu1 %v2475_v41 }
 0x176   :  { %v2300_v25 = vpack.c.bf16 %v2404_v5, %v2403_v20  ;;  %v1801_v20 = vld [vmem:[%s3119_s6 + $0x20] sm:$0xff] }
 0x178   :  { %2255 = vmatpush3.bf16.xpose.msk.msra.mxu0 %vm2704_vm4, %v2253_v17  ;;  %2292 = vmatpush3.bf16.msra.mxu1 %v2291_v19  ;;  %v2297_v17 = vpack.c.bf16 %v2399_v10, %v2398_v12  ;;  %v1352_v10 = vld [vmem:[%s3119_s6] sm:$0xff]  ;;  %v1353_v12 = vld [vmem:[%s3119_s6 + $0x8] sm:$0xff] }
 0x179   :  { %2256 = vmatprep.subr.bf16.mxu0 %v2475_v41  ;;  %2293 = vmatprep.subr.bf16.mxu1 %v2475_v41  ;;  %v2320_v58 = vpack.c.bf16 %v1353_v12, %v1352_v10 }
 0x17c   :  { %2295 = vmatpush3.bf16.msra.mxu1 %v2294_v49 }
 0x17d   :  { %2157 = vmatprep.subr.mxu1 %v2477_v42 }
 0x180   :  { %2259 = vmatpush3.bf16.xpose.msk.msra.mxu0 %vm2704_vm4, %v2257_v21  ;;  %v2407_v21 = vpop.permute.xlu0 %2406 }
 0x181   :  { %2260 = vmatprep.subr.bf16.mxu0 %v2475_v41  ;;  %v2409_v26 = vunpack.i.h.bf16 %v2407_v21  ;;  %v2408_v14 = vunpack.i.l.bf16 %v2407_v21  ;;  %v1802_v21 = vld [vmem:[%s3119_s6 + $0x28] sm:$0xff] }
 0x183   :  { %v2303_v16 = vpack.c.bf16 %v2409_v26, %v2408_v14 }
 0x184   :  { %v2412_v50 = vpop.permute.xlu0 %2411 }
 0x185   :  { %v2413_v28 = vunpack.i.l.bf16 %v2412_v50 }
 0x188   :  { %2263 = vmatpush3.bf16.xpose.msk.msra.mxu0 %vm2704_vm4, %v2261_v27  ;;  %v2414_v27 = vunpack.i.h.bf16 %v2412_v50  ;;  %v2417_v29 = vpop.permute.xlu0 %2416 }
 0x189   :  { %2264 = vmatprep.subr.bf16.mxu0 %v2475_v41  ;;  %v2419_v34 = vunpack.i.h.bf16 %v2417_v29  ;;  %v2418_v36 = vunpack.i.l.bf16 %v2417_v29 }
 0x18b   :  { %v2309_v38 = vpack.c.bf16 %v2419_v34, %v2418_v36 }
 0x190   :  { %2267 = vmatpush3.bf16.xpose.msk.msra.mxu0 %vm2704_vm4, %v2265_v33  ;;  %v2306_v33 = vpack.c.bf16 %v2414_v27, %v2413_v28 }
 0x191   :  { %2268 = vmatprep.subr.bf16.mxu0 %v2475_v41 }
 0x198   :  { %2271 = vmatpush3.bf16.xpose.msk.msra.mxu0 %vm2704_vm4, %v2269_v37  ;;  %v2422_v37 = vpop.permute.xlu1 %2421 }
 0x199   :  { %2296 = vmatprep.subr.bf16.mxu0 %v2475_v41  ;;  %v2424_v39 = vunpack.i.h.bf16 %v2422_v37  ;;  %v2423_v45 = vunpack.i.l.bf16 %v2422_v37 }
 0x19b   :  { %v2312_v46 = vpack.c.bf16 %v2424_v39, %v2423_v45 }
 0x19f   :  { %2085 = vmatmul.mubr.msk.f32.vlgmr.msra.gmra.mrb[6].mxu0 %vm44_vm2, %v2758_v15 }
 0x1a0   :  { %2298 = vmatpush3.bf16.msra.mxu0 %v2297_v17  ;;  %2154 = vmatprep.mubr.msk.f32.mxu0 %vm2476_vm3, %v2477_v42  ;;  %v1355_v17 = vld [vmem:[%s3119_s6 + $0x18] sm:$0xff] }
 0x1a1   :  { %2299 = vmatprep.subr.bf16.mxu0 %v2475_v41 }
 0x1a4   :  { %2301 = vmatpush3.bf16.msra.mxu0 %v2300_v25  ;;  %v2328_v25 = vpack.c.bf16 %v1802_v21, %v1801_v20 }
 0x1a5   :  { %2302 = vmatprep.subr.bf16.mxu0 %v2475_v41 }
 0x1a8   :  { %2304 = vmatpush3.bf16.msra.mxu0 %v2303_v16 }
 0x1a9   :  { %2305 = vmatprep.subr.bf16.mxu0 %v2475_v41 }
 0x1ac   :  { %2307 = vmatpush3.bf16.msra.mxu0 %v2306_v33 }
 0x1ad   :  { %2308 = vmatprep.subr.bf16.mxu0 %v2475_v41 }
 0x1b0   :  { %2310 = vmatpush3.bf16.msra.mxu0 %v2309_v38 }
 0x1b1   :  { %2311 = vmatprep.subr.bf16.mxu0 %v2475_v41 }
 0x1b4   :  { %2313 = vmatpush3.bf16.msra.mxu0 %v2312_v46 }
 0x1b5   :  { %2314 = vmatprep.subr.bf16.mxu0 %v2475_v41 }
 0x1ef   :  { %v801_v40 = vpop.f32.mrb[32].mxu1 }
 0x1f0   :  { %930 = vmax.xlane.f32.xlu0 %v801_v40  ;;  %v2051_v47 = vpop.f32.mrb[33].mxu1 }
 0x206   :  { %2426 = vrot.lane.b32.xlu0 %v2425_v24, %s2478_s16 }
 0x22e   :  { %v606_v48 = vpop.f32.mrb[2].mxu0 }
 0x22f   :  { %v2011_v52 = vpop.f32.mrb[3].mxu0  ;;  %v924_v53 = vsel %vm923_vm5, %v606_v48, -inf }
 0x230   :  { %925 = vmax.xlane.f32.xlu1 %v924_v53  ;;  %v1804_v52 = vld [vmem:[%s3119_s6 + $0x38] sm:$0xff] }
 0x232   :  { %v683_v54 = vpop.f32.mrb[4].mxu0 }
 0x233   :  { %v2016_v55 = vpop.f32.mrb[5].mxu0  ;;  %v927_v56 = vsel %vm923_vm5, %v683_v54, -inf }
 0x241   :  { %2431 = vrot.lane.b32.xlu1 %v2430_v32, %s2478_s16 }
 0x265   :  { %928 = vmax.xlane.f32.xlu1 %v927_v56 }
 0x272   :  { %v919_v60 = vpop.f32.mrb[6].mxu0 }
 0x273   :  { %v2086_v62 = vpop.f32.mrb[7].mxu0  ;;  %932 = vmax.xlane.f32.xlu0 %v919_v60 }
 0x276   :  { %1272 = vrot.lane.b32.xlu1 %v2758_v15, %s2479_s5 }
 0x27d   :  { %v931_v23 = vpop.xlane.xlu0 %930 }
 0x281   :  { %v2427_v30 = vpop.permute.xlu0 %2426 }
 0x282   :  { %v2429_v24 = vunpack.i.h.bf16 %v2427_v30  ;;  %v2428_v0 = vunpack.i.l.bf16 %v2427_v30 }
 0x284   :  { %v2315_v2 = vpack.c.bf16 %v2429_v24, %v2428_v0 }
 0x286   :  { %2316 = vmatpush3.bf16.msra.mxu0 %v2315_v2  ;;  %v1807_v2 = vld [vmem:[%s3119_s6 + $0x40] sm:$0xff] }
 0x287   :  { %2317 = vmatprep.subr.bf16.mxu0 %v2475_v41 }
 0x289   :  { %1196 = vrot.lane.b32.xlu0 %v2739_v6, %s2479_s5 }
 0x2bd   :  { %v926_v35 = vpop.xlane.xlu1 %925 }
 0x2be   :  { %v934_v31 = vmax.f32 %v926_v35, %v931_v23  ;;  %v1808_v35 = vld [vmem:[%s3119_s6 + $0x48] sm:$0xff] }
 0x2c0   :  { %v936_v32 = vsub.f32 %v606_v48, %v934_v31  ;;  %v942_v44 = vsub.f32 %v801_v40, %v934_v31  ;;  %v1803_v48 = vld [vmem:[%s3119_s6 + $0x30] sm:$0xff]  ;;  %v2336_v31 = vpack.c.bf16 %v1808_v35, %v1807_v2 }
 0x2c1   :  { %v2432_v57 = vpop.permute.xlu1 %2431  ;;  %v2332_v53 = vpack.c.bf16 %v1804_v52, %v1803_v48 }
 0x2c2   :  { %v938_v61 = vmul.f32 1.442695, %v936_v32  ;;  %v944_v63 = vmul.f32 1.442695, %v942_v44  ;;  %v2434_v4 = vunpack.i.h.bf16 %v2432_v57  ;;  %v2433_v8 = vunpack.i.l.bf16 %v2432_v57  ;;  %v1809_v32 = vld [vmem:[%s3119_s6 + $0x50] sm:$0xff]  ;;  %v1810_v44 = vld [vmem:[%s3119_s6 + $0x58] sm:$0xff] }
 0x2c3   :  { %v2340_v57 = vpack.c.bf16 %v1810_v44, %v1809_v32 }
 0x2c4   :  { %2435 = vpow2.f32 %v938_v61  ;;  %v2318_v15 = vpack.c.bf16 %v2434_v4, %v2433_v8 }
 0x2c5   :  { %2437 = vpow2.f32 %v944_v63 }
 0x2c6   :  { %2319 = vmatpush3.bf16.msra.mxu0 %v2318_v15 }
 0x2c7   :  { %2337 = vmatprep.subr.bf16.mxu0 %v2336_v31 }
 0x2ce   :  { %v2436_v51 = vpop.eup %2435 }
 0x2cf   :  { %v2438_v11 = vpop.eup %2437  ;;  %v948_v13 = vsel %vm923_vm5, %v2436_v51, 0.0 }
 0x2d0   :  { %954 = vadd.xlane.f32.xlu1 %v2438_v11  ;;  %2120 = vmatmul.mubr.f32.vlgmr.msra.gmra.mrb[34].mxu1 %v2438_v11 }
 0x2d1   :  { %949 = vadd.xlane.f32.xlu0 %v948_v13  ;;  %2159 = vmatprep.mubr.msk.f32.mxu1 %vm2476_vm3, %v2477_v42 }
 0x2f2   :  { %v929_v41 = vpop.xlane.xlu1 %928 }
 0x2f6   :  { %v1273_v7 = vpop.permute.xlu1 %1272 }
 0x300   :  { %v933_v6 = vpop.xlane.xlu0 %932 }
 0x301   :  { %v935_v59 = vmax.f32 %v929_v41, %v933_v6 }
 0x303   :  { %v937_v1 = vsub.f32 %v683_v54, %v935_v59  ;;  %v943_v43 = vsub.f32 %v919_v60, %v935_v59  ;;  %v1356_v54 = vlaneseq  ;;  %v3060_v60 = vld [vmem:[%s3120_s7] sm:$0x7f] }
 0x304   :  { %v1197_v3 = vpop.permute.xlu0 %1196 }
 0x305   :  { %v940_v18 = vmul.f32 1.442695, %v937_v1  ;;  %v946_v19 = vmul.f32 1.442695, %v943_v43  ;;  %2158 = vmatpush3.msra.mxu1 %v1197_v3  ;;  %v3054_v55 = vshrl.u32 %v1356_v54, 7 }
 0x306   :  { %2160 = vmatmul.mubr.msk.f32.vlgmr.msra.gmra.mrb[34].mxu1 %vm923_vm5, %v2436_v51  ;;  %2162 = vmatprep.subr.mxu1 %v2477_v42 }
 0x307   :  { %2439 = vpow2.f32 %v940_v18  ;;  %2163 = vmatpush3.msra.mxu1 %v1273_v7  ;;  %2164 = vmatprep.mubr.msk.f32.mxu1 %vm2476_vm3, %v2477_v42  ;;  %v1354_v42 = vld [vmem:[%s3119_s6 + $0x10] sm:$0xff]  ;;  %v1358_v56 = vsub.s32 0, %v3054_v55  ;;  %v1448_v61 = vsub.s32 1, %v3054_v55  ;;  %s2480_s6 = smov [#allocation2]  }
 0x308   :  { %2441 = vpow2.f32 %v946_v19  ;;  %2321 = vmatprep.subr.bf16.mxu1 %v2320_v58  ;;  %v2324_v5 = vpack.c.bf16 %v1355_v17, %v1354_v42  ;;  %s1712_s13 = sshll.u32 %s2480_s6, 4  ;;  %s1713_s13 = int_to_ptr.vmem [resolvable:$true] %s1712_s13 }
 0x309   :  { %v1359_v62 = vrot.slane %v3060_v60, %v1358_v56  ;;  %v1449_v63 = vrot.slane %v3060_v60, %v1448_v61  ;;  %s2451_s14 = scalar_lea.vmem %s1713_s13, 256  ;;  %p2456_p1 = scmp.lt.s32.totalorder %s1713_s13, %s1713_s13 }
 0x30a   :  { %p2452_p0 = scmp.ne.s32.totalorder %s1713_s13, %s2451_s14  ;;  %p2457_p2 = scmp.lt.s32.totalorder %s2451_s14, %s2451_s14 }
 0x30c   :  { %p2458_p3 = por %p2457_p2, %p2456_p1 }
 0x30e   :  { %p2459_p4 = pnand %p2458_p3, %p2452_p0 }
 0x311   :  { %v2440_v22 = vpop.eup %2439 }
 0x312   :  { %v2442_v49 = vpop.eup %2441  ;;  %2165 = vmatmul.mubr.msk.f32.vlgmr.msra.gmra.mrb[36].mxu1 %vm923_vm5, %v2440_v22  ;;  %v951_v9 = vsel %vm923_vm5, %v2440_v22, 0.0 }
 0x313   :  { %2155 = vmatmul.mubr.f32.vlgmr.msra.gmra.mrb[8].mxu0 %v2442_v49  ;;  %952 = vadd.xlane.f32.xlu0 %v951_v9 }
 0x314   :  { %2323 = vmatpush3.bf16.msra.mxu1 %v2320_v58  ;;  %2339 = vmatpush3.bf16.msra.mxu0 %v2336_v31 }
 0x315   :  { %2325 = vmatprep.subr.bf16.mxu1 %v2324_v5  ;;  %2341 = vmatprep.subr.bf16.mxu0 %v2340_v57 }
 0x317   :  { %956 = vadd.xlane.f32.xlu0 %v2442_v49 }
 0x318   :  { %2327 = vmatpush3.bf16.msra.mxu1 %v2324_v5  ;;  %2343 = vmatpush3.bf16.msra.mxu0 %v2340_v57 }
 0x319   :  { %2329 = vmatprep.subr.bf16.mxu1 %v2328_v25 }
 0x35d   :  { %v955_v26 = vpop.xlane.xlu1 %954 }
 0x35e   :  { %v950_v14 = vpop.xlane.xlu0 %949 }
 0x35f   :  { %v958_v50 = vadd.f32 %v955_v26, %v950_v14 }
 0x361   :  { %2443 = vrcp.f32 %v958_v50  ;;  %v1561_v50 = vsub.s32 2, %v3054_v55 }
 0x36b   :  { %v2444_v28 = vpop.eup %2443 }
 0x3a0   :  { %v953_v16 = vpop.xlane.xlu0 %952 }
 0x3a4   :  { %v957_v27 = vpop.xlane.xlu0 %956 }
 0x3a5   :  { %v959_v33 = vadd.f32 %v957_v27, %v953_v16  ;;  %v1567_v16 = vsub.s32 3, %v3054_v55  ;;  %v1562_v27 = vrot.slane %v3060_v60, %v1561_v50 }
 0x3a7   :  { %2445 = vrcp.f32 %v959_v33 }
 0x3b1   :  { %v2446_v40 = vpop.eup %2445 }
 0x3d9   :  { %v1268_v29 = vpop.f32.mrb[34].mxu1 }
 0x3da   :  { %v1350_v34 = vmul.f32 %v2444_v28, %v1268_v29  ;;  %v2161_v36 = vpop.f32.mrb[35].mxu1 }
 0x3dc   :  { %2175 = vmatprep.mubr.msk.f32.mxu1 %vm44_vm2, %v1350_v34  ;;  %v1568_v34 = vrot.slane %v3060_v60, %v1567_v16 }
 0x3e5   :  { %v1344_v37 = vpop.f32.mrb[36].mxu1 }
 0x3e6   :  { %v1192_v38 = vpop.f32.mrb[8].mxu0  ;;  %v2166_v39 = vpop.f32.mrb[37].mxu1 }
 0x3e7   :  { %v1345_v45 = vadd.f32 %v1344_v37, %v1192_v38  ;;  %v2156_v46 = vpop.f32.mrb[9].mxu0 }
 0x3e9   :  { %v1351_v47 = vmul.f32 %v2446_v40, %v1345_v45  ;;  %v1580_v40 = vsub.s32 4, %v3054_v55 }
 0x3eb   :  { %2176 = vmatmul.mubr.msk.f32.vlgmr.msra.gmra.mrb[38].mxu1 %vm44_vm2, %v1351_v47  ;;  %v1581_v47 = vrot.slane %v3060_v60, %v1580_v40 }
 0x3ec   :  { %2331 = vmatpush3.bf16.msra.mxu1 %v2328_v25 }
 0x3ed   :  { %2333 = vmatprep.subr.bf16.mxu1 %v2332_v53 }
 0x3f0   :  { %2335 = vmatpush3.bf16.msra.mxu1 %v2332_v53 }
 0x4be   :  { %v2177_v23 = vpop.f32.mrb[38].mxu1 }
 0x4bf   :  { %v1432_v30 = vpop.f32.mrb[39].mxu1  ;;  %v1438_v0 = vadd.f32 %v2177_v23, %v1359_v62 }
 0x4c0   :  { %v1433_v24 = vadd.f32 %v1432_v30, %v1359_v62 }
 0x4c2   :  { %2186 = vmatprep.mubr.msk.f32.mxu1 %vm44_vm2, %v1433_v24 }
 0x4c3   :  { %2187 = vmatmul.mubr.msk.f32.vlgmr.msra.gmra.mrb[40].mxu1 %vm44_vm2, %v1438_v0 }
 0x596   :  { %v2188_v4 = vpop.f32.mrb[40].mxu1 }
 0x597   :  { %v1528_v8 = vadd.f32 %v2188_v4, %v1449_v63  ;;  %v1522_v15 = vpop.f32.mrb[41].mxu1 }
 0x598   :  { %v1523_v51 = vadd.f32 %v1522_v15, %v1449_v63 }
 0x599   :  { %v1532_v11 = vsel %vm44_vm2, %v1528_v8, 0.0 }
 0x59a   :  { %v1531_v13 = vsel %vm44_vm2, %v1523_v51, 0.0 }
 0x59b   :  { %v1533_v41 = vadd.f32 %v1532_v11, %v1531_v13 }
 0x59d   :  { %v1534_v6 = vrot.slane %v1533_v41, 4 }
 0x59f   :  { %v1535_v59 = vadd.f32 %v1534_v6, %v1533_v41 }
 0x5a1   :  { %v1536_v1 = vrot.slane %v1535_v59, 2 }
 0x5a3   :  { %v1537_v43 = vadd.f32 %v1536_v1, %v1535_v59 }
 0x5a5   :  { %v1538_v3 = vrot.slane %v1537_v43, 1 }
 0x5a7   :  { %v1539_v18 = vadd.f32 %v1538_v3, %v1537_v43  ;;  %v1693_v3 = vsub.s32 5, %v3054_v55 }
 0x5a9   :  { %v1540_v19 = vmul.f32 0.0625, %v1539_v18  ;;  %v1699_v18 = vsub.s32 6, %v3054_v55 }
 0x5ab   :  { %v1541_v7 = vsub.f32 %v1523_v51, %v1540_v19  ;;  %v1542_v22 = vsub.f32 %v1528_v8, %v1540_v19  ;;  %v1694_v19 = vrot.slane %v3060_v60, %v1693_v3 }
 0x5ad   :  { %v1543_v49 = vmul.f32 %v1541_v7, %v1541_v7  ;;  %v1544_v9 = vmul.f32 %v1542_v22, %v1542_v22 }
 0x5af   :  { %v1545_v10 = vsel %vm44_vm2, %v1543_v49, 0.0  ;;  %v1546_v12 = vsel %vm44_vm2, %v1544_v9, 0.0  ;;  %v1700_v9 = vrot.slane %v3060_v60, %v1699_v18 }
 0x5b0   :  { %v1547_v58 = vadd.f32 %v1546_v12, %v1545_v10 }
 0x5b2   :  { %v1548_v42 = vrot.slane %v1547_v58, 4 }
 0x5b4   :  { %v1549_v17 = vadd.f32 %v1548_v42, %v1547_v58 }
 0x5b6   :  { %v1550_v5 = vrot.slane %v1549_v17, 2 }
 0x5b8   :  { %v1551_v20 = vadd.f32 %v1550_v5, %v1549_v17 }
 0x5ba   :  { %v1552_v21 = vrot.slane %v1551_v20, 1 }
 0x5bc   :  { %v1553_v25 = vadd.f32 %v1552_v21, %v1551_v20 }
 0x5be   :  { %v1554_v26 = vmul.f32 0.0625, %v1553_v25 }
 0x5c0   :  { %v1555_v14 = vadd.f32 1e-05, %v1554_v26 }
 0x5c2   :  { %2447 = vrsqrt.f32 %v1555_v14 }
 0x5cc   :  { %v2448_v28 = vpop.eup %2447 }
 0x5cd   :  { %v1557_v29 = vmul.f32 %v2448_v28, %v1541_v7  ;;  %v1558_v33 = vmul.f32 %v2448_v28, %v1542_v22 }
 0x5cf   :  { %v1563_v36 = vmul.f32 %v1562_v27, %v1557_v29  ;;  %v1564_v37 = vmul.f32 %v1562_v27, %v1558_v33 }
 0x5d1   :  { %v1569_v38 = vadd.f32 %v1568_v34, %v1563_v36  ;;  %v1570_v39 = vadd.f32 %v1568_v34, %v1564_v37 }
 0x5d3   :  { %v1571_v45 = vmax.f32 %v1569_v38, 0.0  ;;  %v1572_v46 = vmax.f32 %v1570_v39, 0.0 }
 0x5d5   :  { %2197 = vmatprep.mubr.msk.f32.mxu0 %vm44_vm2, %v1571_v45 }
 0x5d6   :  { %2198 = vmatmul.mubr.msk.f32.vlgmr.msra.gmra.mrb[10].mxu0 %vm44_vm2, %v1572_v46 }
 0x6a9   :  { %v2199_v48 = vpop.f32.mrb[10].mxu0 }
 0x6aa   :  { %v1660_v52 = vadd.f32 %v2199_v48, %v1581_v47  ;;  %v1654_v53 = vpop.f32.mrb[11].mxu0 }
 0x6ab   :  { %v1655_v54 = vadd.f32 %v1654_v53, %v1581_v47 }
 0x6ac   :  { %v1664_v56 = vsel %vm44_vm2, %v1660_v52, 0.0 }
 0x6ad   :  { %v1663_v62 = vsel %vm44_vm2, %v1655_v54, 0.0 }
 0x6ae   :  { %v1665_v23 = vadd.f32 %v1664_v56, %v1663_v62 }
 0x6b0   :  { %v1666_v30 = vrot.slane %v1665_v23, 4 }
 0x6b2   :  { %v1667_v24 = vadd.f32 %v1666_v30, %v1665_v23 }
 0x6b4   :  { %v1668_v0 = vrot.slane %v1667_v24, 2 }
 0x6b6   :  { %v1669_v2 = vadd.f32 %v1668_v0, %v1667_v24 }
 0x6b8   :  { %v1670_v35 = vrot.slane %v1669_v2, 1 }
 0x6ba   :  { %v1671_v31 = vadd.f32 %v1670_v35, %v1669_v2 }
 0x6bc   :  { %v1672_v32 = vmul.f32 0.0625, %v1671_v31 }
 0x6be   :  { %v1673_v44 = vsub.f32 %v1655_v54, %v1672_v32  ;;  %v1674_v57 = vsub.f32 %v1660_v52, %v1672_v32 }
 0x6c0   :  { %v1675_v61 = vmul.f32 %v1673_v44, %v1673_v44  ;;  %v1676_v63 = vmul.f32 %v1674_v57, %v1674_v57 }
 0x6c2   :  { %v1677_v4 = vsel %vm44_vm2, %v1675_v61, 0.0  ;;  %v1678_v8 = vsel %vm44_vm2, %v1676_v63, 0.0 }
 0x6c3   :  { %v1679_v15 = vadd.f32 %v1678_v8, %v1677_v4 }
 0x6c5   :  { %v1680_v51 = vrot.slane %v1679_v15, 4 }
 0x6c7   :  { %v1681_v11 = vadd.f32 %v1680_v51, %v1679_v15 }
 0x6c9   :  { %v1682_v13 = vrot.slane %v1681_v11, 2 }
 0x6cb   :  { %v1683_v41 = vadd.f32 %v1682_v13, %v1681_v11 }
 0x6cd   :  { %v1684_v6 = vrot.slane %v1683_v41, 1 }
 0x6cf   :  { %v1685_v59 = vadd.f32 %v1684_v6, %v1683_v41 }
 0x6d1   :  { %v1686_v1 = vmul.f32 0.0625, %v1685_v59 }
 0x6d3   :  { %v1687_v43 = vadd.f32 1e-05, %v1686_v1 }
 0x6d5   :  { %2449 = vrsqrt.f32 %v1687_v43 }
 0x6df   :  { %v2450_v7 = vpop.eup %2449 }
 0x6e0   :  { %v1689_v22 = vmul.f32 %v2450_v7, %v1673_v44  ;;  %v1690_v49 = vmul.f32 %v2450_v7, %v1674_v57 }
 0x6e2   :  { %v1695_v10 = vmul.f32 %v1694_v19, %v1689_v22  ;;  %v1696_v12 = vmul.f32 %v1694_v19, %v1690_v49 }
 0x6e4   :  { %v1701_v58 = vadd.f32 %v1700_v9, %v1695_v10  ;;  %v1702_v42 = vadd.f32 %v1700_v9, %v1696_v12 }
 0x6e6   :  { %v1703_v17 = vmax.f32 %v1701_v58, 0.0  ;;  %v1704_v5 = vmax.f32 %v1702_v42, 0.0 }
 0x6e8   :  { %1705 = vst.msk [vmem:[#allocation2] sm:$0xff] %vm44_vm2, %v1703_v17  ;;  %1706 = vst.msk [vmem:[#allocation2 + $0x8] sm:$0xff] %vm44_vm2, %v1704_v5 }
 0x6e9   :  { %2462 = shalt.err (!%p2459_p4)
}
 0x6ea   :  { %s2463_s15 = scalar_lea.hbm %s3121_s8, 256 }
 0x6eb   :  { %p2464_p5 = scmp.ne.s32.totalorder %s3121_s8, %s2463_s15  ;;  %p2467_p6 = scmp.lt.u32.totalorder %s2463_s15, %s3121_s8 }
 0x6ed   :  { %p2469_p7 = pnand %p2467_p6, %p2464_p5 }
 0x6ef   :  { %2472 = shalt.err (!%p2469_p7)
}
 0x6f0   :  { %s2481_s20 = smov 128   ;;  %s2482_s21 = smov 8  }
 0x6f1   :  { %1718 = dma.vmem_to_hbm [thread:$0]  %s1713_s13, 256, %s3121_s8, [#allocation3], %s2481_s20, %s2481_s20, %s2482_s21  }
 0x6f2   :  { %2473 = dma.done.wait [#allocation3], 256  }
 0x6f3   :  { %2474 = vsyncadd [#allocation3], 4294967040 }
 0x6f4   :  { %1722 = vsyncpa [#allocation3], 1 }

</bundles_post_ra>
